<compile_context>
chip_gen: v7x
topology: tpu7x:2x2x1
jax: 0.10.0
libtpu: 0.0.40
codegen_flags: <defaults>
</compile_context>

<pallas_src>
import functools

import jax
import jax.numpy as jnp
from jax.experimental import pallas as pl
from jax.experimental.pallas import tpu as pltpu


def _round_up(v, m):
    return ((v + m - 1) // m) * m


def sage_conv_kernel(a_ref, xk_ref, xi_ref, invdeg_ref, wl_ref, wr_ref, b_ref,
                     o_ref, acc_ref, *, apply_relu):
    k = pl.program_id(1)

    @pl.when(k == 0)
    def _():
        acc_ref[...] = jnp.zeros_like(acc_ref)

    # Un-normalized neighbor sum for this row block (bf16 MXU inputs, f32 acc).
    acc_ref[...] += jnp.dot(a_ref[...], xk_ref[...],
                            preferred_element_type=jnp.float32)

    @pl.when(k == pl.num_programs(1) - 1)
    def _():
        # mean aggregation = accumulated sum * 1/in_degree (f32, exact scaling)
        agg = (acc_ref[...] * invdeg_ref[...]).astype(jnp.bfloat16)
        # Two MXU matmuls (no concat copy): lin_l(mean_agg) + lin_r(x_root)
        out = jnp.dot(agg, wl_ref[...], preferred_element_type=jnp.float32)
        out = out + jnp.dot(xi_ref[...], wr_ref[...],
                            preferred_element_type=jnp.float32)
        out = out + b_ref[...]          # (1, H) bias broadcasts over rows
        if apply_relu:
            out = jnp.maximum(out, 0.0)
        o_ref[...] = out.astype(o_ref.dtype)


def _vmem_limit_bytes(tm, tk, F, H, out_itemsize):
    """Double-buffered VMEM footprint estimate + headroom, capped at 64 MiB."""
    a = tm * tk * 2
    xk = tk * F * 2
    xi = tm * F * 2
    idg = tm * 4
    w = 2 * F * H * 2          # Wl + Wr, bf16
    b = H * 4
    out = tm * H * out_itemsize
    acc = tm * F * 4
    need = 2 * (a + xk + xi + idg + w + b + out) + acc
    return int(min(64 << 20, max(32 << 20, int(need * 1.5))))


def sage_conv(A, x, inv_deg, w_l, w_r, b, *, apply_relu, tm, tk):
    """One SAGEConv layer (PyG semantics: out = lin_l(mean_agg(x)) + lin_r(x)).

    A:       (Np, Np) bf16 edge-count adjacency (dst rows, src cols)
    x:       (Np, F)  bf16 node features (F multiple of 128)
    inv_deg: (Np, 1)  f32 1/max(in_degree, 1)
    w_l:     (F, H)   bf16 neighbor projection   (H multiple of 128)
    w_r:     (F, H)   bf16 root projection
    b:       (1, H)   f32 bias (lin_l bias only, per PyG SAGEConv)
    """
    Np, F = x.shape
    H = w_l.shape[1]
    grid = (Np // tm, Np // tk)
    kernel = functools.partial(sage_conv_kernel, apply_relu=apply_relu)

    out_dtype = jnp.bfloat16 if apply_relu else jnp.float32
    out_itemsize = 2 if apply_relu else 4

    # FLOPs: aggregation matmul + two projections.
    flops = 2 * Np * Np * F + 4 * Np * F * H
    # Bytes: A once, streamed X re-read (Np//tm) times, root X / weights / bias
    # once each (index_map constant over k), output written once.
    bytes_accessed = (Np * Np * 2
                      + (Np // tm) * Np * F * 2
                      + Np * F * 2
                      + Np * 4
                      + 2 * F * H * 2
                      + H * 4
                      + Np * H * out_itemsize)

    return pl.pallas_call(
        kernel,
        out_shape=jax.ShapeDtypeStruct((Np, H), out_dtype),
        grid_spec=pltpu.PrefetchScalarGridSpec(
            num_scalar_prefetch=0,
            grid=grid,
            in_specs=[
                pl.BlockSpec((tm, tk), lambda i, k: (i, k)),    # A tile
                pl.BlockSpec((tk, F), lambda i, k: (k, 0)),     # X streamed over K
                pl.BlockSpec((tm, F), lambda i, k: (i, 0)),     # X row block (root term)
                pl.BlockSpec((tm, 1), lambda i, k: (i, 0)),     # 1/deg per row
                pl.BlockSpec((F, H), lambda i, k: (0, 0)),      # W_l (neighbor)
                pl.BlockSpec((F, H), lambda i, k: (0, 0)),      # W_r (root)
                pl.BlockSpec((1, H), lambda i, k: (0, 0)),      # bias
            ],
            out_specs=pl.BlockSpec((tm, H), lambda i, k: (i, 0)),
            scratch_shapes=[pltpu.VMEM((tm, F), jnp.float32)],
        ),
        compiler_params=pltpu.CompilerParams(
            dimension_semantics=("parallel", "arbitrary"),
            vmem_limit_bytes=_vmem_limit_bytes(tm, tk, F, H, out_itemsize)),
        cost_estimate=pl.CostEstimate(
            flops=int(flops), transcendentals=0,
            bytes_accessed=int(bytes_accessed)),
    )(A, x, x, inv_deg, w_l, w_r, b)


def build_adjacency(edge_index, n_pad):
    """Un-normalized adjacency (edge counts, bf16) + inverse in-degree (f32).

    Matches PyG SAGEConv(aggr='mean') flow source->target: row i aggregates
    features of source nodes j for every edge j->i; isolated nodes -> 0.
    """
    src = edge_index[0]
    dst = edge_index[1]
    ones = jnp.ones(src.shape[0], dtype=jnp.float32)
    A = jnp.zeros((n_pad, n_pad), dtype=jnp.float32).at[dst, src].add(ones)
    deg = jnp.zeros((n_pad,), dtype=jnp.float32).at[dst].add(ones)
    inv_deg = (1.0 / jnp.maximum(deg, 1.0))[:, None]
    return A.astype(jnp.bfloat16), inv_deg


def init_sage_params(key, dims):
    """dims = [in, hidden, ..., out]; returns list of (w_l, w_r, b) per layer.

    Weights are zero-padded to 128-multiples and stored bf16 (MXU input dtype);
    bias stays f32, shape (1, f_out_pad).
    """
    params = []
    for i in range(len(dims) - 1):
        f_in, f_out = dims[i], dims[i + 1]
        f_in_p, f_out_p = _round_up(f_in, 128), _round_up(f_out, 128)
        key, k1, k2 = jax.random.split(key, 3)
        scale = 1.0 / jnp.sqrt(jnp.float32(f_in))
        w_l = jax.random.uniform(k1, (f_in, f_out), jnp.float32, -scale, scale)
        w_r = jax.random.uniform(k2, (f_in, f_out), jnp.float32, -scale, scale)
        w_l_p = (jnp.zeros((f_in_p, f_out_p), jnp.float32)
                 .at[:f_in, :f_out].set(w_l)).astype(jnp.bfloat16)
        w_r_p = (jnp.zeros((f_in_p, f_out_p), jnp.float32)
                 .at[:f_in, :f_out].set(w_r)).astype(jnp.bfloat16)
        b = jnp.zeros((1, f_out_p), jnp.float32)
        params.append((w_l_p, w_r_p, b))
    return params


def _pick_tiles(N):
    """Decoupled (tm, tk): tm up to 512, tk up to 1024, tk a multiple of tm."""
    n128 = _round_up(N, 128)
    tm = min(512, n128)
    tk = min(1024, _round_up(n128, tm))
    n_pad = _round_up(N, max(tm, tk))
    return tm, tk, n_pad


def graphsage_forward(x, edge_index, params, num_classes):
    """GraphSAGE forward, inference mode (dropout = identity)."""
    N, F = x.shape
    tm, tk, n_pad = _pick_tiles(N)
    f_pad = _round_up(F, 128)

    A, inv_deg = build_adjacency(edge_index, n_pad)
    # bf16 activations in HBM: halves the dominant streamed bytes (X is re-read
    # Np/tm times per layer); accumulation inside the kernel stays f32.
    h = (jnp.zeros((n_pad, f_pad), jnp.float32).at[:N, :F].set(x)
         ).astype(jnp.bfloat16)

    for li, (w_l, w_r, b) in enumerate(params):
        is_last = li == len(params) - 1
        h = sage_conv(A, h, inv_deg, w_l, w_r, b,
                      apply_relu=not is_last, tm=tm, tk=tk)
        # Non-final layers return bf16; final layer returns f32.
    return h[:N, :num_classes]


if __name__ == "__main__":
    # Small, deterministic problem: 32 nodes, 16 features, 32 hidden, 8 classes.
    num_nodes = 32
    num_node_features = 16
    num_hidden = 32
    num_classes = 8
    num_edges = 64

    key = jax.random.PRNGKey(0)
    kx, ke_src, ke_dst, kp = jax.random.split(key, 4)

    x = jax.random.normal(kx, (num_nodes, num_node_features), jnp.float32)
    src = jax.random.randint(ke_src, (num_edges,), 0, num_nodes, jnp.int32)
    dst = jax.random.randint(ke_dst, (num_edges,), 0, num_nodes, jnp.int32)
    edge_index = jnp.stack([src, dst], axis=0)  # (2, E), PyG convention

    params = init_sage_params(kp, [num_node_features, num_hidden, num_classes])

    out = graphsage_forward(x, edge_index, params, num_classes)
    out = jax.block_until_ready(out)
    assert out.shape == (num_nodes, num_classes)
    assert out.dtype == jnp.float32
    print("KERNEL_OK")
</pallas_src>

<mosaic_0001>
module attributes {stable_mosaic.version = 11 : i64} {
  func.func @sage_conv_kernel(%arg0: i32, %arg1: i32, %arg2: memref<128x128xbf16, #tpu.memory_space<vmem>>, %arg3: memref<128x128xbf16, #tpu.memory_space<vmem>>, %arg4: memref<128x128xbf16, #tpu.memory_space<vmem>>, %arg5: memref<128x1xf32, #tpu.memory_space<vmem>>, %arg6: memref<128x128xbf16, #tpu.memory_space<vmem>>, %arg7: memref<128x128xbf16, #tpu.memory_space<vmem>>, %arg8: memref<1x128xf32, #tpu.memory_space<vmem>>, %arg9: memref<128x128xbf16, #tpu.memory_space<vmem>>, %arg10: memref<128x128xf32, #tpu.memory_space<vmem>>) attributes {dimension_semantics = [#tpu.dimension_semantics<parallel>, #tpu.dimension_semantics<arbitrary>], iteration_bounds = array<i64: 1, 1>, scalar_prefetch = 0 : i64, scratch_operands = 1 : i64, tpu.core_type = #tpu.core_type<tc>, window_params = [{transform_indices = @transform_0, window_bounds = array<i64: 128, 128>}, {transform_indices = @transform_1, window_bounds = array<i64: 128, 128>}, {transform_indices = @transform_2, window_bounds = array<i64: 128, 128>}, {transform_indices = @transform_3, window_bounds = array<i64: 128, 1>}, {pipeline_mode = #tpu.pipeline_mode<synchronous>, transform_indices = @transform_4, window_bounds = array<i64: 128, 128>}, {pipeline_mode = #tpu.pipeline_mode<synchronous>, transform_indices = @transform_5, window_bounds = array<i64: 128, 128>}, {pipeline_mode = #tpu.pipeline_mode<synchronous>, transform_indices = @transform_6, window_bounds = array<i64: 1, 128>}, {transform_indices = @transform_7, window_bounds = array<i64: 128, 128>}]} {
    %c0_i32 = arith.constant 0 : i32
    %0 = arith.cmpi eq, %arg1, %c0_i32 : i32
    %1 = arith.extui %0 : i1 to i32
    %c0_i32_0 = arith.constant 0 : i32
    %2 = arith.cmpi ne, %1, %c0_i32_0 : i32
    scf.if %2 {
      %cst_10 = arith.constant 0.000000e+00 : f32
      %12 = vector.broadcast %cst_10 : f32 to vector<128x128xf32>
      %c0_11 = arith.constant 0 : index
      %c0_12 = arith.constant 0 : index
      %13 = vector.load %arg10[%c0_11, %c0_12] : memref<128x128xf32, #tpu.memory_space<vmem>>, vector<128x128xf32>
      tpu.vector_store %arg10[%c0_11, %c0_12], %12 {strides = array<i32>} : memref<128x128xf32, #tpu.memory_space<vmem>>, vector<128x128xf32>,
    } else {
    }
    %c0 = arith.constant 0 : index
    %c0_1 = arith.constant 0 : index
    %3 = vector.load %arg10[%c0, %c0_1] : memref<128x128xf32, #tpu.memory_space<vmem>>, vector<128x128xf32>
    %c0_2 = arith.constant 0 : index
    %c0_3 = arith.constant 0 : index
    %4 = vector.load %arg2[%c0_2, %c0_3] : memref<128x128xbf16, #tpu.memory_space<vmem>>, vector<128x128xbf16>
    %c0_4 = arith.constant 0 : index
    %c0_5 = arith.constant 0 : index
    %5 = vector.load %arg3[%c0_4, %c0_5] : memref<128x128xbf16, #tpu.memory_space<vmem>>, vector<128x128xbf16>
    %cst = arith.constant dense<0.000000e+00> : vector<128x128xf32>
    %6 = tpu.matmul %4, %5, %cst {dimension_numbers = #tpu.dot_dimension_numbers<[1], [0], [0], [1], [0, 0, 1, 1], [], []>} : vector<128x128xbf16>, vector<128x128xbf16>, vector<128x128xf32> -> vector<128x128xf32>
    %7 = arith.addf %3, %6 : vector<128x128xf32>
    %c0_6 = arith.constant 0 : index
    %c0_7 = arith.constant 0 : index
    %8 = vector.load %arg10[%c0_6, %c0_7] : memref<128x128xf32, #tpu.memory_space<vmem>>, vector<128x128xf32>
    tpu.vector_store %arg10[%c0_6, %c0_7], %7 {strides = array<i32>} : memref<128x128xf32, #tpu.memory_space<vmem>>, vector<128x128xf32>,
    %c0_i32_8 = arith.constant 0 : i32
    %9 = arith.cmpi eq, %arg1, %c0_i32_8 : i32
    %10 = arith.extui %9 : i1 to i32
    %c0_i32_9 = arith.constant 0 : i32
    %11 = arith.cmpi ne, %10, %c0_i32_9 : i32
    scf.if %11 {
      %c0_10 = arith.constant 0 : index
      %c0_11 = arith.constant 0 : index
      %12 = vector.load %arg10[%c0_10, %c0_11] : memref<128x128xf32, #tpu.memory_space<vmem>>, vector<128x128xf32>
      %c0_12 = arith.constant 0 : index
      %c0_13 = arith.constant 0 : index
      %13 = vector.load %arg5[%c0_12, %c0_13] : memref<128x1xf32, #tpu.memory_space<vmem>>, vector<128x1xf32>
      %14 = vector.broadcast %13 : vector<128x1xf32> to vector<128x128xf32>
      %15 = arith.mulf %12, %14 : vector<128x128xf32>
      %16 = arith.truncf %15 : vector<128x128xf32> to vector<128x128xbf16>
      %c0_14 = arith.constant 0 : index
      %c0_15 = arith.constant 0 : index
      %17 = vector.load %arg6[%c0_14, %c0_15] : memref<128x128xbf16, #tpu.memory_space<vmem>>, vector<128x128xbf16>
      %cst_16 = arith.constant dense<0.000000e+00> : vector<128x128xf32>
      %18 = tpu.matmul %16, %17, %cst_16 {dimension_numbers = #tpu.dot_dimension_numbers<[1], [0], [0], [1], [0, 0, 1, 1], [], []>} : vector<128x128xbf16>, vector<128x128xbf16>, vector<128x128xf32> -> vector<128x128xf32>
      %c0_17 = arith.constant 0 : index
      %c0_18 = arith.constant 0 : index
      %19 = vector.load %arg4[%c0_17, %c0_18] : memref<128x128xbf16, #tpu.memory_space<vmem>>, vector<128x128xbf16>
      %c0_19 = arith.constant 0 : index
      %c0_20 = arith.constant 0 : index
      %20 = vector.load %arg7[%c0_19, %c0_20] : memref<128x128xbf16, #tpu.memory_space<vmem>>, vector<128x128xbf16>
      %cst_21 = arith.constant dense<0.000000e+00> : vector<128x128xf32>
      %21 = tpu.matmul %19, %20, %cst_21 {dimension_numbers = #tpu.dot_dimension_numbers<[1], [0], [0], [1], [0, 0, 1, 1], [], []>} : vector<128x128xbf16>, vector<128x128xbf16>, vector<128x128xf32> -> vector<128x128xf32>
      %22 = arith.addf %18, %21 : vector<128x128xf32>
      %c0_22 = arith.constant 0 : index
      %c0_23 = arith.constant 0 : index
      %23 = vector.load %arg8[%c0_22, %c0_23] : memref<1x128xf32, #tpu.memory_space<vmem>>, vector<1x128xf32>
      %24 = vector.broadcast %23 : vector<1x128xf32> to vector<128x128xf32>
      %25 = arith.addf %22, %24 : vector<128x128xf32>
      %cst_24 = arith.constant 0.000000e+00 : f32
      %26 = vector.broadcast %cst_24 : f32 to vector<128x128xf32>
      %27 = arith.maximumf %25, %26 : vector<128x128xf32>
      %28 = arith.truncf %27 : vector<128x128xf32> to vector<128x128xbf16>
      %c0_25 = arith.constant 0 : index
      %c0_26 = arith.constant 0 : index
      %29 = vector.load %arg9[%c0_25, %c0_26] : memref<128x128xbf16, #tpu.memory_space<vmem>>, vector<128x128xbf16>
      tpu.vector_store %arg9[%c0_25, %c0_26], %28 {strides = array<i32>} : memref<128x128xbf16, #tpu.memory_space<vmem>>, vector<128x128xbf16>,
    } else {
    }
    return
  }
  func.func @transform_0(%arg0: i32, %arg1: i32) -> (i32, i32) {
    %c0_i32 = arith.constant 0 : i32
    return %arg0, %arg1 : i32, i32
  }
  func.func @transform_1(%arg0: i32, %arg1: i32) -> (i32, i32) {
    %c0_i32 = arith.constant 0 : i32
    %c0_i32_0 = arith.constant 0 : i32
    return %arg1, %c0_i32 : i32, i32
  }
  func.func @transform_2(%arg0: i32, %arg1: i32) -> (i32, i32) {
    %c0_i32 = arith.constant 0 : i32
    %c0_i32_0 = arith.constant 0 : i32
    return %arg0, %c0_i32 : i32, i32
  }
  func.func @transform_3(%arg0: i32, %arg1: i32) -> (i32, i32) {
    %c0_i32 = arith.constant 0 : i32
    %c0_i32_0 = arith.constant 0 : i32
    return %arg0, %c0_i32 : i32, i32
  }
  func.func @transform_4(%arg0: i32, %arg1: i32) -> (i32, i32) {
    %c0_i32 = arith.constant 0 : i32
    %c0_i32_0 = arith.constant 0 : i32
    %c0_i32_1 = arith.constant 0 : i32
    return %c0_i32, %c0_i32_0 : i32, i32
  }
  func.func @transform_5(%arg0: i32, %arg1: i32) -> (i32, i32) {
    %c0_i32 = arith.constant 0 : i32
    %c0_i32_0 = arith.constant 0 : i32
    %c0_i32_1 = arith.constant 0 : i32
    return %c0_i32, %c0_i32_0 : i32, i32
  }
  func.func @transform_6(%arg0: i32, %arg1: i32) -> (i32, i32) {
    %c0_i32 = arith.constant 0 : i32
    %c0_i32_0 = arith.constant 0 : i32
    %c0_i32_1 = arith.constant 0 : i32
    return %c0_i32, %c0_i32_0 : i32, i32
  }
  func.func @transform_7(%arg0: i32, %arg1: i32) -> (i32, i32) {
    %c0_i32 = arith.constant 0 : i32
    %c0_i32_0 = arith.constant 0 : i32
    return %arg0, %c0_i32 : i32, i32
  }
}

</mosaic_0001>

<bundles_post_ra>
// kernel: tpu_custom_call.1
= control target key start
LH: loop header
LB: loop body
LE: loop exit
PB: predicated region body
PF: predicated region fallthrough
CT: control target
= control target key end

     0   :  { %12 = vsyncpa [#allocation4], 0  ;;  %s1700_s0 = inlined_call_operand.vmem [shape: bf16[128,128], index: 0, kind: input, shape index: {}]   ;;  %s1701_s1 = inlined_call_operand.vmem [shape: bf16[128,128], index: 1, kind: input, shape index: {}]   ;;  %s1702_s2 = inlined_call_operand.hbm [shape: bf16[128,128], index: 2, kind: input, shape index: {}]   ;;  %s1703_s3 = inlined_call_operand.vmem [shape: f32[128,1], index: 3, kind: input, shape index: {}]   ;;  %s1704_s4 = inlined_call_operand.hbm [shape: bf16[128,128], index: 4, kind: input, shape index: {}]   ;;  %s1705_s5 = inlined_call_operand.hbm [shape: bf16[128,128], index: 5, kind: input, shape index: {}]   ;;  %s1706_s6 = inlined_call_operand.vmem [shape: f32[1,128], index: 6, kind: input, shape index: {}]   ;;  %s1707_s7 = inlined_call_operand.hbm [shape: bf16[128,128], index: 7, kind: output, shape index: {}]  }
   0x1   :  { %13 = vsyncpa [#allocation7], 0 }
   0x2   :  { %14 = vsyncpa [#allocation5], 0  ;;  %s1463_s24 = smov [#allocation6]   ;;  %s1464_s26 = smov [#allocation3]  }
   0x3   :  { %s38_s25 = sshll.u32 %s1463_s24, 4  ;;  %s24_s27 = sshll.u32 %s1464_s26, 4  ;;  %s39_s25 = int_to_ptr.vmem [resolvable:$true] %s38_s25  ;;  %s1510_s27 = int_to_ptr.vmem [resolvable:$true] %s24_s27 }
   0x4   :  { %s1369_s30 = scalar_lea.hbm %s1704_s4, 1024 }
   0x5   :  { %p1370_p0 = scmp.ne.s32.totalorder %s1704_s4, %s1369_s30  ;;  %p1373_p1 = scmp.lt.u32.totalorder %s1369_s30, %s1704_s4 }
   0x7   :  { %p1375_p2 = pnand %p1373_p1, %p1370_p0 }
   0x9   :  { %1378 = shalt.err (!%p1375_p2)
}
   0xa   :  { %s1379_s12 = scalar_lea.vmem %s39_s25, 1024  ;;  %p1384_p4 = scmp.lt.s32.totalorder %s39_s25, %s39_s25 }
   0xb   :  { %p1380_p3 = scmp.ne.s32.totalorder %s39_s25, %s1379_s12  ;;  %p1385_p5 = scmp.lt.s32.totalorder %s1379_s12, %s1379_s12 }
   0xd   :  { %p1386_p6 = por %p1385_p5, %p1384_p4 }
   0xf   :  { %p1387_p7 = pnand %p1386_p6, %p1380_p3 }
  0x11   :  { %1390 = shalt.err (!%p1387_p7)
}
  0x12   :  { %s1465_s13 = smov 64   ;;  %s1466_s14 = smov 4  }
  0x13   :  { %44 = dma.hbm_to_vmem [thread:$0]  %s1704_s4, 1024, %s39_s25, [#allocation7], %s1465_s13, %s1465_s13, %s1466_s14  }
  0x14   :  { %s1391_s19 = scalar_lea.hbm %s1702_s2, 1024 }
  0x15   :  { %p1392_p8 = scmp.ne.s32.totalorder %s1702_s2, %s1391_s19  ;;  %p1395_p9 = scmp.lt.u32.totalorder %s1391_s19, %s1702_s2 }
  0x17   :  { %p1397_p10 = pnand %p1395_p9, %p1392_p8 }
  0x19   :  { %1400 = shalt.err (!%p1397_p10)
}
  0x1a   :  { %s1401_s24 = scalar_lea.vmem %s1510_s27, 1024  ;;  %p1406_p12 = scmp.lt.s32.totalorder %s1510_s27, %s1510_s27 }
  0x1b   :  { %p1402_p11 = scmp.ne.s32.totalorder %s1510_s27, %s1401_s24  ;;  %p1407_p13 = scmp.lt.s32.totalorder %s1401_s24, %s1401_s24 }
  0x1d   :  { %p1408_p0 = por %p1407_p13, %p1406_p12 }
  0x1f   :  { %p1409_p1 = pnand %p1408_p0, %p1402_p11 }
  0x21   :  { %1412 = shalt.err (!%p1409_p1)
}
  0x22   :  { %30 = dma.hbm_to_vmem [thread:$0]  %s1702_s2, 1024, %s1510_s27, [#allocation4], %s1465_s13, %s1465_s13, %s1466_s14  }
  0x23   :  { %s1467_s26 = smov [#allocation8]   ;;  %s1413_s8 = scalar_lea.hbm %s1705_s5, 1024 }
  0x24   :  { %s50_s28 = sshll.u32 %s1467_s26, 4  ;;  %p1414_p2 = scmp.ne.s32.totalorder %s1705_s5, %s1413_s8  ;;  %s51_s28 = int_to_ptr.vmem [resolvable:$true] %s50_s28 }
  0x25   :  { %p1417_p3 = scmp.lt.u32.totalorder %s1413_s8, %s1705_s5 }
  0x27   :  { %p1419_p4 = pnand %p1417_p3, %p1414_p2 }
  0x29   :  { %1422 = shalt.err (!%p1419_p4)
}
  0x2a   :  { %s1423_s15 = scalar_lea.vmem %s51_s28, 1024  ;;  %p1428_p6 = scmp.lt.s32.totalorder %s51_s28, %s51_s28 }
  0x2b   :  { %p1424_p5 = scmp.ne.s32.totalorder %s51_s28, %s1423_s15  ;;  %p1429_p7 = scmp.lt.s32.totalorder %s1423_s15, %s1423_s15 }
  0x2d   :  { %p1430_p8 = por %p1429_p7, %p1428_p6 }
  0x2f   :  { %p1431_p9 = pnand %p1430_p8, %p1424_p5 }
  0x31   :  { %1434 = shalt.err (!%p1431_p9)
}
  0x32   :  { %56 = dma.hbm_to_vmem [thread:$0]  %s1705_s5, 1024, %s51_s28, [#allocation7], %s1465_s13, %s1465_s13, %s1466_s14  }
  0x33   :  { %1457 = dma.done.wait [#allocation4], 1024  }
  0x34   :  { %1458 = vsyncadd [#allocation4], 4294966272 }
  0x35   :  { %1459 = dma.done.wait [#allocation7], 2048  }
  0x36   :  { %1460 = vsyncadd [#allocation7], 4294965248  ;;  %v1468_v0 = vmov 0   ;;  %v1329_v1 = vld [vmem:[%s1701_s1] sm:$0xff]   ;;  %v1330_v2 = vld [vmem:[%s1701_s1 + $0x8] sm:$0xff]  }
  0x37   :  { %1328 = vset.pattern.permute.xlu1 %v1468_v0  ;;  %1327 = vset.pattern.permute.xlu0 %v1468_v0  ;;  %v1331_v3 = vld [vmem:[%s1701_s1 + $0x10] sm:$0xff]   ;;  %v1332_v4 = vld [vmem:[%s1701_s1 + $0x18] sm:$0xff]   ;;  %v1337_v5 = vld [vmem:[%s1700_s0] sm:$0xff]  }
  0x38   :  { %1192 = vmatprep.subr.bf16.mxu0 %v1329_v1  ;;  %1208 = vmatprep.mubr.bf16.mxu0 %v1337_v5  ;;  %v1333_v6 = vld [vmem:[%s1701_s1 + $0x20] sm:$0xff]   ;;  %v1334_v7 = vld [vmem:[%s1701_s1 + $0x28] sm:$0xff]   ;;  %v383_v8 = vld [vmem:[%s1703_s3 + $0x10] sm:$0xff] }
  0x39   :  { %1193 = vmatpush3.bf16.msra.mxu0 %v1329_v1  ;;  %v381_v9 = vld [vmem:[%s1703_s3] sm:$0xff]  ;;  %409 = vperm.xlu1 %1328, %v383_v8   ;;  %v384_v10 = vld [vmem:[%s1703_s3 + $0x18] sm:$0xff]  ;;  %v382_v11 = vld [vmem:[%s1703_s3 + $0x8] sm:$0xff] }
  0x3a   :  { %1194 = vmatprep.subr.bf16.mxu0 %v1330_v2  ;;  %399 = vperm.xlu0 %1327, %v381_v9   ;;  %v1335_v12 = vld [vmem:[%s1701_s1 + $0x30] sm:$0xff]   ;;  %v390_v13 = vld [vmem:[%s1703_s3 + $0x48] sm:$0xff]  ;;  %v389_v14 = vld [vmem:[%s1703_s3 + $0x40] sm:$0xff] }
  0x3b   :  { %v1345_v15 = vld [vmem:[#allocation8] sm:$0xff]   ;;  %v1346_v16 = vld [vmem:[#allocation8 + $0x8] sm:$0xff]   ;;  %v1336_v17 = vld [vmem:[%s1701_s1 + $0x38] sm:$0xff]  }
  0x3c   :  { %1224 = vmatprep.subr.bf16.mxu1 %v1345_v15  ;;  %v392_v18 = vld [vmem:[%s1703_s3 + $0x58] sm:$0xff]  ;;  %v391_v19 = vld [vmem:[%s1703_s3 + $0x50] sm:$0xff]  ;;  %v1338_v21 = vld [vmem:[%s1700_s0 + $0x8] sm:$0xff]  }
  0x3d   :  { %1195 = vmatpush3.bf16.msra.mxu0 %v1330_v2  ;;  %414 = vperm.xlu1 %1328, %v384_v10   ;;  %v1347_v20 = vld [vmem:[#allocation8 + $0x10] sm:$0xff]   ;;  %v1616_v22 = vld [vmem:[#allocation6] sm:$0xff]   ;;  %v386_v24 = vld [vmem:[%s1703_s3 + $0x28] sm:$0xff] }
  0x3e   :  { %1196 = vmatprep.subr.bf16.mxu0 %v1331_v3  ;;  %404 = vperm.xlu0 %1327, %v382_v11   ;;  %v1339_v23 = vld [vmem:[%s1700_s0 + $0x10] sm:$0xff]   ;;  %v385_v25 = vld [vmem:[%s1703_s3 + $0x20] sm:$0xff]  ;;  %v1348_v26 = vld [vmem:[#allocation8 + $0x18] sm:$0xff]  }
  0x3f   :  { %1225 = vmatpush3.bf16.msra.mxu1 %v1345_v15  ;;  %v388_v27 = vld [vmem:[%s1703_s3 + $0x38] sm:$0xff]  ;;  %v387_v28 = vld [vmem:[%s1703_s3 + $0x30] sm:$0xff]  ;;  %v1356_v29 = vld [vmem:[#allocation3] sm:$0xff]  }
  0x40   :  { %1226 = vmatprep.subr.bf16.mxu1 %v1346_v16  ;;  %v1352_v30 = vld [vmem:[#allocation6 + $0x8] sm:$0xff]   ;;  %v1349_v31 = vld [vmem:[#allocation8 + $0x20] sm:$0xff]   ;;  %v1340_v32 = vld [vmem:[%s1700_s0 + $0x18] sm:$0xff]   ;;  %1240 = vmatprep.mubr.bf16.mxu1 %v1356_v29 }
  0x41   :  { %1197 = vmatpush3.bf16.msra.mxu0 %v1331_v3  ;;  %444 = vperm.xlu1 %1328, %v390_v13   ;;  %v394_v33 = vld [vmem:[%s1703_s3 + $0x68] sm:$0xff]  ;;  %v393_v34 = vld [vmem:[%s1703_s3 + $0x60] sm:$0xff]  ;;  %v396_v37 = vld [vmem:[%s1703_s3 + $0x78] sm:$0xff] }
  0x42   :  { %1198 = vmatprep.subr.bf16.mxu0 %v1332_v4  ;;  %439 = vperm.xlu0 %1327, %v389_v14   ;;  %v1341_v35 = vld [vmem:[%s1700_s0 + $0x20] sm:$0xff]   ;;  %v1351_v36 = vld [vmem:[#allocation8 + $0x28] sm:$0xff]   ;;  %v395_v38 = vld [vmem:[%s1703_s3 + $0x70] sm:$0xff] }
  0x43   :  { %1227 = vmatpush3.bf16.msra.mxu1 %v1346_v16  ;;  %v1354_v39 = vld [vmem:[#allocation6 + $0x10] sm:$0xff]   ;;  %v1357_v41 = vld [vmem:[#allocation6 + $0x18] sm:$0xff]   ;;  %v1342_v42 = vld [vmem:[%s1700_s0 + $0x28] sm:$0xff]  }
  0x44   :  { %1228 = vmatprep.subr.bf16.mxu1 %v1347_v20  ;;  %v1353_v40 = vld [vmem:[#allocation8 + $0x30] sm:$0xff]   ;;  %v1355_v44 = vld [vmem:[#allocation8 + $0x38] sm:$0xff]   ;;  %v1359_v45 = vld [vmem:[#allocation6 + $0x20] sm:$0xff]  }
  0x45   :  { %1199 = vmatpush3.bf16.msra.mxu0 %v1332_v4  ;;  %454 = vperm.xlu1 %1328, %v392_v18   ;;  %v1343_v43 = vld [vmem:[%s1700_s0 + $0x30] sm:$0xff]   ;;  %v1358_v46 = vld [vmem:[#allocation3 + $0x8] sm:$0xff]   ;;  %v1344_v48 = vld [vmem:[%s1700_s0 + $0x38] sm:$0xff]  }
  0x46   :  { %1200 = vmatprep.subr.bf16.mxu0 %v1333_v6  ;;  %449 = vperm.xlu0 %1327, %v391_v19   ;;  %v1361_v47 = vld [vmem:[#allocation6 + $0x28] sm:$0xff]   ;;  %v1360_v49 = vld [vmem:[#allocation3 + $0x10] sm:$0xff]   ;;  %v1362_v50 = vld [vmem:[#allocation3 + $0x18] sm:$0xff]  }
  0x47   :  { %1229 = vmatpush3.bf16.msra.mxu1 %v1347_v20  ;;  %v1363_v51 = vld [vmem:[#allocation6 + $0x30] sm:$0xff]   ;;  %v1364_v52 = vld [vmem:[#allocation6 + $0x38] sm:$0xff]   ;;  %v1365_v53 = vld [vmem:[#allocation3 + $0x20] sm:$0xff]  }
  0x48   :  { %1230 = vmatprep.subr.bf16.mxu1 %v1348_v26  ;;  %v1366_v54 = vld [vmem:[#allocation3 + $0x28] sm:$0xff]   ;;  %v1367_v55 = vld [vmem:[#allocation3 + $0x30] sm:$0xff]   ;;  %v1368_v56 = vld [vmem:[#allocation3 + $0x38] sm:$0xff]  }
  0x49   :  { %1201 = vmatpush3.bf16.msra.mxu0 %v1333_v6  ;;  %424 = vperm.xlu1 %1328, %v386_v24  }
  0x4a   :  { %1202 = vmatprep.subr.bf16.mxu0 %v1334_v7  ;;  %419 = vperm.xlu0 %1327, %v385_v25  }
  0x4b   :  { %1231 = vmatpush3.bf16.msra.mxu1 %v1348_v26 }
  0x4c   :  { %1232 = vmatprep.subr.bf16.mxu1 %v1349_v31 }
  0x4d   :  { %1203 = vmatpush3.bf16.msra.mxu0 %v1334_v7  ;;  %434 = vperm.xlu1 %1328, %v388_v27  }
  0x4e   :  { %1204 = vmatprep.subr.bf16.mxu0 %v1335_v12  ;;  %429 = vperm.xlu0 %1327, %v387_v28  }
  0x4f   :  { %1233 = vmatpush3.bf16.msra.mxu1 %v1349_v31 }
  0x50   :  { %1234 = vmatprep.subr.bf16.mxu1 %v1351_v36 }
  0x51   :  { %1205 = vmatpush3.bf16.msra.mxu0 %v1335_v12  ;;  %464 = vperm.xlu1 %1328, %v394_v33  }
  0x52   :  { %1206 = vmatprep.subr.bf16.mxu0 %v1336_v17  ;;  %459 = vperm.xlu0 %1327, %v393_v34  }
  0x53   :  { %1235 = vmatpush3.bf16.msra.mxu1 %v1351_v36 }
  0x54   :  { %1236 = vmatprep.subr.bf16.mxu1 %v1353_v40 }
  0x55   :  { %1207 = vmatpush3.bf16.msra.mxu0 %v1336_v17  ;;  %474 = vperm.xlu1 %1328, %v396_v37  }
  0x56   :  { %1256 = vmatprep.subr.bf16.mxu0 %v1616_v22  ;;  %469 = vperm.xlu0 %1327, %v395_v38  }
  0x57   :  { %1237 = vmatpush3.bf16.msra.mxu1 %v1353_v40 }
  0x58   :  { %1209 = vmatmul.mubr.bf16.vlgmr.msra.gmra.mrb[0].mxu0 %v1338_v21  ;;  %1238 = vmatprep.subr.bf16.mxu1 %v1355_v44 }
  0x59   :  { %1212 = vmatprep.mubr.bf16.mxu0 %v1339_v23  ;;  %1257 = vmatpush3.bf16.msra.mxu0 %v1616_v22 }
  0x5a   :  { %1258 = vmatprep.subr.bf16.mxu0 %v1352_v30 }
  0x5b   :  { %1239 = vmatpush3.bf16.msra.mxu1 %v1355_v44 }
  0x5c   :  { %1288 = vmatprep.subr.bf16.mxu1 %v1616_v22 }
  0x5d   :  { %1259 = vmatpush3.bf16.msra.mxu0 %v1352_v30 }
  0x5e   :  { %1260 = vmatprep.subr.bf16.mxu0 %v1354_v39  ;;  %1241 = vmatmul.mubr.bf16.vlgmr.msra.gmra.mrb[0].mxu1 %v1358_v46 }
  0x5f   :  { %1296 = vmatpush3.bf16.msra.mxu1 %v1616_v22  ;;  %1244 = vmatprep.mubr.bf16.mxu1 %v1360_v49 }
  0x60   :  { %1213 = vmatmul.mubr.bf16.gmra.mrb[4].mxu0 %v1340_v32  ;;  %1289 = vmatprep.subr.bf16.mxu1 %v1352_v30 }
  0x61   :  { %1216 = vmatprep.mubr.bf16.mxu0 %v1341_v35  ;;  %1261 = vmatpush3.bf16.msra.mxu0 %v1354_v39 }
  0x62   :  { %1262 = vmatprep.subr.bf16.mxu0 %v1357_v41 }
  0x63   :  { %1297 = vmatpush3.bf16.msra.mxu1 %v1352_v30 }
  0x64   :  { %1290 = vmatprep.subr.bf16.mxu1 %v1354_v39 }
  0x65   :  { %1263 = vmatpush3.bf16.msra.mxu0 %v1357_v41 }
  0x66   :  { %1264 = vmatprep.subr.bf16.mxu0 %v1359_v45  ;;  %1245 = vmatmul.mubr.bf16.gmra.mrb[4].mxu1 %v1362_v50 }
  0x67   :  { %1298 = vmatpush3.bf16.msra.mxu1 %v1354_v39  ;;  %1248 = vmatprep.mubr.bf16.mxu1 %v1365_v53 }
  0x68   :  { %1217 = vmatmul.mubr.bf16.gmra.mrb[8].mxu0 %v1342_v42  ;;  %1291 = vmatprep.subr.bf16.mxu1 %v1357_v41 }
  0x69   :  { %1220 = vmatprep.mubr.bf16.mxu0 %v1343_v43  ;;  %1265 = vmatpush3.bf16.msra.mxu0 %v1359_v45 }
  0x6a   :  { %1266 = vmatprep.subr.bf16.mxu0 %v1361_v47 }
  0x6b   :  { %1299 = vmatpush3.bf16.msra.mxu1 %v1357_v41 }
  0x6c   :  { %1292 = vmatprep.subr.bf16.mxu1 %v1359_v45 }
  0x6d   :  { %1267 = vmatpush3.bf16.msra.mxu0 %v1361_v47 }
  0x6e   :  { %1268 = vmatprep.subr.bf16.mxu0 %v1363_v51  ;;  %1249 = vmatmul.mubr.bf16.gmra.mrb[8].mxu1 %v1366_v54 }
  0x6f   :  { %1300 = vmatpush3.bf16.msra.mxu1 %v1359_v45  ;;  %1252 = vmatprep.mubr.bf16.mxu1 %v1367_v55 }
  0x70   :  { %1221 = vmatmul.mubr.bf16.gmra.mrb[12].mxu0 %v1344_v48  ;;  %1293 = vmatprep.subr.bf16.mxu1 %v1361_v47 }
  0x71   :  { %1269 = vmatpush3.bf16.msra.mxu0 %v1363_v51 }
  0x72   :  { %1270 = vmatprep.subr.bf16.mxu0 %v1364_v52 }
  0x73   :  { %1301 = vmatpush3.bf16.msra.mxu1 %v1361_v47 }
  0x74   :  { %1294 = vmatprep.subr.bf16.mxu1 %v1363_v51 }
  0x75   :  { %1271 = vmatpush3.bf16.msra.mxu0 %v1364_v52 }
  0x76   :  { %1253 = vmatmul.mubr.bf16.gmra.mrb[12].mxu1 %v1368_v56 }
  0x77   :  { %1302 = vmatpush3.bf16.msra.mxu1 %v1363_v51 }
  0x78   :  { %1295 = vmatprep.subr.bf16.mxu1 %v1364_v52 }
  0x7b   :  { %1303 = vmatpush3.bf16.msra.mxu1 %v1364_v52 }
  0xb8   :  { %v410_v57 = vpop.permute.xlu1 %409 }
  0xb9   :  { %v400_v58 = vpop.permute.xlu0 %399 }
  0xbc   :  { %v415_v59 = vpop.permute.xlu1 %414 }
  0xbd   :  { %v405_v60 = vpop.permute.xlu0 %404 }
  0xc0   :  { %v445_v61 = vpop.permute.xlu1 %444 }
  0xc1   :  { %v440_v62 = vpop.permute.xlu0 %439 }
  0xc4   :  { %v455_v63 = vpop.permute.xlu1 %454 }
  0xc5   :  { %v450_v0 = vpop.permute.xlu0 %449 }
  0xc8   :  { %v425_v4 = vpop.permute.xlu1 %424 }
  0xc9   :  { %v420_v8 = vpop.permute.xlu0 %419 }
  0xcc   :  { %v435_v14 = vpop.permute.xlu1 %434 }
  0xcd   :  { %v430_v16 = vpop.permute.xlu0 %429 }
  0xd0   :  { %v465_v25 = vpop.permute.xlu1 %464 }
  0xd1   :  { %v460_v27 = vpop.permute.xlu0 %459 }
  0xd4   :  { %v475_v36 = vpop.permute.xlu1 %474 }
  0xd5   :  { %v470_v38 = vpop.permute.xlu0 %469 }
 0x12b   :  { %v1210_v1 = vpop.f32.mrb[0].mxu0 }
 0x12c   :  { %v267_v2 = vpop.f32.mrb[1].mxu0  ;;  %v479_v5 = vmul.f32 %v1210_v1, %v410_v57 }
 0x12d   :  { %v1211_v3 = vpop.f32.mrb[2].mxu0  ;;  %v477_v9 = vmul.f32 %v400_v58, %v267_v2  ;;  %v1667_v58 = vld [vmem:[%s1706_s6] ss:$0 sm:$0xff]  ;;  %s1469_s6 = smov [#allocation9]  }
 0x12e   :  { %v480_v6 = vmul.f32 %v1211_v3, %v415_v59  ;;  %v270_v7 = vpop.f32.mrb[3].mxu0  ;;  %s1011_s29 = sshll.u32 %s1469_s6, 4  ;;  %s1012_s29 = int_to_ptr.vmem [resolvable:$true] %s1011_s29 }
 0x12f   :  { %v478_v10 = vmul.f32 %v405_v60, %v270_v7  ;;  %s1435_s30 = scalar_lea.vmem %s1012_s29, 1024  ;;  %p1440_p11 = scmp.lt.s32.totalorder %s1012_s29, %s1012_s29 }
 0x130   :  { %v494_v11 = vpack.c.bf16 %v480_v6, %v479_v5  ;;  %p1436_p10 = scmp.ne.s32.totalorder %s1012_s29, %s1435_s30  ;;  %p1441_p12 = scmp.lt.s32.totalorder %s1435_s30, %s1435_s30 }
 0x131   :  { %v493_v12 = vpack.c.bf16 %v478_v10, %v477_v9  ;;  %v1242_v39 = vpop.f32.mrb[0].mxu1 }
 0x132   :  { %v679_v41 = vpop.f32.mrb[1].mxu1  ;;  %p1442_p13 = por %p1441_p12, %p1440_p11 }
 0x133   :  { %v1214_v13 = vpop.f32.mrb[4].mxu0  ;;  %1272 = vmatprep.mubr.bf16.mxu0 %v493_v12  ;;  %v1243_v43 = vpop.f32.mrb[2].mxu1 }
 0x134   :  { %v283_v15 = vpop.f32.mrb[5].mxu0  ;;  %1273 = vmatmul.mubr.bf16.vlgmr.msra.gmra.mrb[16].mxu0 %v494_v11  ;;  %v483_v18 = vmul.f32 %v1214_v13, %v430_v16  ;;  %v682_v45 = vpop.f32.mrb[3].mxu1  ;;  %p1443_p0 = pnand %p1442_p13, %p1436_p10 }
 0x135   :  { %v1215_v17 = vpop.f32.mrb[6].mxu0  ;;  %v481_v21 = vmul.f32 %v420_v8, %v283_v15 }
 0x136   :  { %v484_v19 = vmul.f32 %v1215_v17, %v435_v14  ;;  %v286_v20 = vpop.f32.mrb[7].mxu0 }
 0x137   :  { %v482_v22 = vmul.f32 %v425_v4, %v286_v20 }
 0x138   :  { %v496_v23 = vpack.c.bf16 %v484_v19, %v483_v18 }
 0x139   :  { %v495_v24 = vpack.c.bf16 %v482_v22, %v481_v21  ;;  %v1246_v53 = vpop.f32.mrb[4].mxu1 }
 0x13a   :  { %v695_v54 = vpop.f32.mrb[5].mxu1 }
 0x13b   :  { %v1218_v26 = vpop.f32.mrb[8].mxu0  ;;  %1276 = vmatprep.mubr.bf16.mxu0 %v495_v24  ;;  %v1247_v55 = vpop.f32.mrb[6].mxu1 }
 0x13c   :  { %v299_v28 = vpop.f32.mrb[9].mxu0  ;;  %1277 = vmatmul.mubr.bf16.gmra.mrb[20].mxu0 %v496_v23  ;;  %v487_v30 = vmul.f32 %v1218_v26, %v450_v0  ;;  %v698_v56 = vpop.f32.mrb[7].mxu1 }
 0x13d   :  { %v1219_v29 = vpop.f32.mrb[10].mxu0  ;;  %v485_v33 = vmul.f32 %v440_v62, %v299_v28 }
 0x13e   :  { %v488_v31 = vmul.f32 %v1219_v29, %v455_v63  ;;  %v302_v32 = vpop.f32.mrb[11].mxu0 }
 0x13f   :  { %v486_v34 = vmul.f32 %v445_v61, %v302_v32 }
 0x140   :  { %v498_v35 = vpack.c.bf16 %v488_v31, %v487_v30 }
 0x141   :  { %v497_v37 = vpack.c.bf16 %v486_v34, %v485_v33 }
 0x143   :  { %v1222_v40 = vpop.f32.mrb[12].mxu0  ;;  %1280 = vmatprep.mubr.bf16.mxu1 %v497_v37 }
 0x144   :  { %v315_v42 = vpop.f32.mrb[13].mxu0  ;;  %1281 = vmatmul.mubr.bf16.vlgmr.msra.gmra.mrb[8].mxu1 %v498_v35  ;;  %v491_v46 = vmul.f32 %v1222_v40, %v470_v38 }
 0x145   :  { %v1223_v44 = vpop.f32.mrb[14].mxu0  ;;  %v489_v49 = vmul.f32 %v460_v27, %v315_v42 }
 0x146   :  { %v492_v47 = vmul.f32 %v1223_v44, %v475_v36  ;;  %v318_v48 = vpop.f32.mrb[15].mxu0 }
 0x147   :  { %v490_v50 = vmul.f32 %v465_v25, %v318_v48 }
 0x148   :  { %v500_v51 = vpack.c.bf16 %v492_v47, %v491_v46 }
 0x149   :  { %v499_v52 = vpack.c.bf16 %v490_v50, %v489_v49 }
 0x14b   :  { %1284 = vmatprep.mubr.bf16.mxu1 %v499_v52 }
 0x14c   :  { %1285 = vmatmul.mubr.bf16.gmra.mrb[12].mxu1 %v500_v51 }
 0x207   :  { %v1274_v57 = vpop.f32.mrb[16].mxu0 }
 0x208   :  { %v833_v59 = vadd.f32 %v1274_v57, %v1242_v39  ;;  %v824_v60 = vpop.f32.mrb[17].mxu0 }
 0x209   :  { %v825_v61 = vadd.f32 %v824_v60, %v679_v41  ;;  %v1275_v62 = vpop.f32.mrb[18].mxu0 }
 0x20a   :  { %v896_v63 = vadd.f32 %v1667_v58, %v833_v59  ;;  %v836_v0 = vadd.f32 %v1275_v62, %v1243_v43  ;;  %v827_v1 = vpop.f32.mrb[19].mxu0 }
 0x20b   :  { %v894_v2 = vadd.f32 %v1667_v58, %v825_v61  ;;  %v828_v3 = vadd.f32 %v827_v1, %v682_v45 }
 0x20c   :  { %v897_v4 = vadd.f32 %v1667_v58, %v836_v0  ;;  %v912_v6 = vmax.f32 %v896_v63, 0.0 }
 0x20d   :  { %v895_v5 = vadd.f32 %v1667_v58, %v828_v3  ;;  %v910_v8 = vmax.f32 %v894_v2, 0.0 }
 0x20e   :  { %v913_v7 = vmax.f32 %v897_v4, 0.0 }
 0x20f   :  { %v911_v9 = vmax.f32 %v895_v5, 0.0  ;;  %v1278_v10 = vpop.f32.mrb[20].mxu0 }
 0x210   :  { %v1105_v11 = vpack.c.bf16 %v913_v7, %v912_v6  ;;  %v849_v12 = vadd.f32 %v1278_v10, %v1246_v53  ;;  %v840_v13 = vpop.f32.mrb[21].mxu0 }
 0x211   :  { %v1100_v14 = vpack.c.bf16 %v911_v9, %v910_v8  ;;  %v841_v15 = vadd.f32 %v840_v13, %v695_v54  ;;  %v1279_v16 = vpop.f32.mrb[22].mxu0 }
 0x212   :  { %1137 = vst [vmem:[#allocation9 + $0x8] sm:$0xff] %v1105_v11   ;;  %v900_v17 = vadd.f32 %v1667_v58, %v849_v12  ;;  %v852_v18 = vadd.f32 %v1279_v16, %v1247_v55  ;;  %v843_v19 = vpop.f32.mrb[23].mxu0 }
 0x213   :  { %1101 = vst [vmem:[#allocation9] sm:$0xff] %v1100_v14   ;;  %v898_v20 = vadd.f32 %v1667_v58, %v841_v15  ;;  %v844_v21 = vadd.f32 %v843_v19, %v698_v56 }
 0x214   :  { %v901_v22 = vadd.f32 %v1667_v58, %v852_v18  ;;  %v916_v24 = vmax.f32 %v900_v17, 0.0 }
 0x215   :  { %v899_v23 = vadd.f32 %v1667_v58, %v844_v21  ;;  %v914_v26 = vmax.f32 %v898_v20, 0.0 }
 0x216   :  { %v917_v25 = vmax.f32 %v901_v22, 0.0 }
 0x217   :  { %v915_v27 = vmax.f32 %v899_v23, 0.0  ;;  %v1282_v28 = vpop.f32.mrb[8].mxu1 }
 0x218   :  { %v1115_v29 = vpack.c.bf16 %v917_v25, %v916_v24  ;;  %v904_v30 = vadd.f32 %v1282_v28, %v1667_v58  ;;  %v856_v31 = vpop.f32.mrb[9].mxu1 }
 0x219   :  { %v1110_v32 = vpack.c.bf16 %v915_v27, %v914_v26  ;;  %v902_v33 = vadd.f32 %v1667_v58, %v856_v31  ;;  %v1283_v34 = vpop.f32.mrb[10].mxu1 }
 0x21a   :  { %1139 = vst [vmem:[#allocation9 + $0x18] sm:$0xff] %v1115_v29   ;;  %v905_v35 = vadd.f32 %v1283_v34, %v1667_v58  ;;  %v859_v36 = vpop.f32.mrb[11].mxu1  ;;  %v920_v38 = vmax.f32 %v904_v30, 0.0 }
 0x21b   :  { %1138 = vst [vmem:[#allocation9 + $0x10] sm:$0xff] %v1110_v32   ;;  %v903_v37 = vadd.f32 %v1667_v58, %v859_v36  ;;  %v918_v40 = vmax.f32 %v902_v33, 0.0 }
 0x21c   :  { %v921_v39 = vmax.f32 %v905_v35, 0.0 }
 0x21d   :  { %v919_v41 = vmax.f32 %v903_v37, 0.0 }
 0x21e   :  { %v1125_v42 = vpack.c.bf16 %v921_v39, %v920_v38 }
 0x21f   :  { %v1120_v43 = vpack.c.bf16 %v919_v41, %v918_v40  ;;  %v1286_v44 = vpop.f32.mrb[12].mxu1 }
 0x220   :  { %1141 = vst [vmem:[#allocation9 + $0x28] sm:$0xff] %v1125_v42   ;;  %v908_v45 = vadd.f32 %v1286_v44, %v1667_v58  ;;  %v872_v46 = vpop.f32.mrb[13].mxu1 }
 0x221   :  { %1140 = vst [vmem:[#allocation9 + $0x20] sm:$0xff] %v1120_v43   ;;  %v906_v47 = vadd.f32 %v1667_v58, %v872_v46  ;;  %v1287_v48 = vpop.f32.mrb[14].mxu1 }
 0x222   :  { %v909_v49 = vadd.f32 %v1287_v48, %v1667_v58  ;;  %v875_v50 = vpop.f32.mrb[15].mxu1  ;;  %v924_v52 = vmax.f32 %v908_v45, 0.0 }
 0x223   :  { %v907_v51 = vadd.f32 %v1667_v58, %v875_v50  ;;  %v922_v54 = vmax.f32 %v906_v47, 0.0 }
 0x224   :  { %v925_v53 = vmax.f32 %v909_v49, 0.0 }
 0x225   :  { %v923_v55 = vmax.f32 %v907_v51, 0.0 }
 0x226   :  { %v1135_v56 = vpack.c.bf16 %v925_v53, %v924_v52 }
 0x227   :  { %v1130_v57 = vpack.c.bf16 %v923_v55, %v922_v54 }
 0x228   :  { %1143 = vst [vmem:[#allocation9 + $0x38] sm:$0xff] %v1135_v56  }
 0x229   :  { %1142 = vst [vmem:[#allocation9 + $0x30] sm:$0xff] %v1130_v57  }
 0x22a   :  { %1446 = shalt.err (!%p1443_p0)
}
 0x22b   :  { %s1447_s10 = scalar_lea.hbm %s1707_s7, 1024 }
 0x22c   :  { %p1448_p1 = scmp.ne.s32.totalorder %s1707_s7, %s1447_s10  ;;  %p1451_p2 = scmp.lt.u32.totalorder %s1447_s10, %s1707_s7 }
 0x22e   :  { %p1453_p3 = pnand %p1451_p2, %p1448_p1 }
 0x230   :  { %1456 = shalt.err (!%p1453_p3)
}
 0x231   :  { %1017 = dma.vmem_to_hbm [thread:$0]  %s1012_s29, 1024, %s1707_s7, [#allocation5], %s1465_s13, %s1465_s13, %s1466_s14  }
 0x232   :  { %1461 = dma.done.wait [#allocation5], 1024  }
 0x233   :  { %1462 = vsyncadd [#allocation5], 4294966272 }
 0x234   :  { %1021 = vsyncpa [#allocation4], 1 }
 0x235   :  { %1022 = vsyncpa [#allocation7], 1 }
 0x236   :  { %1023 = vsyncpa [#allocation5], 1 }

</bundles_post_ra>
